<compile_context>
chip_gen: v6e
topology: v6e:2x2x1
jax: 0.10.0
libtpu: 0.0.40
codegen_flags: <defaults>
</compile_context>

<pallas_src>
import functools

import jax
import jax.numpy as jnp
from jax import lax
from jax.experimental import pallas as pl
from jax.experimental.pallas import tpu as pltpu


def _ppr_kernel(a_t_ref, z0_t_ref, out_ref, *, alpha, pow_iter, heads, dim):
    """All heads in one grid step, iterated in the transposed (lane-dense) layout.

    a_t_ref  : (heads, N, N) f32  per-head adjacency, pre-transposed (A_h^T)
    z0_t_ref : (dim, N)      f32  entity embeddings, transposed
    out_ref  : (N, heads*dim)     lane-dense packed output (head-major columns)
    """
    z0_t = z0_t_ref[...]                      # (dim, N): full 128-lane vregs
    az0_t = alpha * z0_t                      # hoisted teleport term

    head_rows = []
    for h in range(heads):                    # heads is small & static -> unrolled
        a_t = a_t_ref[h]                      # (N, N) f32
        z_t = z0_t
        for _ in range(pow_iter):             # pow_iter is small & static -> unrolled
            # Z^T <- Z^T @ A_h^T + alpha*Z0^T ; 128-wide MXU result every pass,
            # f32 accumulation, lane-dense axpy.
            z_t = jnp.dot(z_t, a_t, preferred_element_type=jnp.float32) + az0_t
        head_rows.append(z_t)                 # only 4 f32 vregs live per head

    # Stack heads along sublanes (free), one 128x128 XLU transpose, then a
    # single lane-dense (N, heads*dim) store.
    stacked = jnp.concatenate(head_rows, axis=0)      # (heads*dim, N)
    out_ref[...] = stacked.T.astype(out_ref.dtype)    # (N, heads*dim)


def ppr_power_iteration(edge_index, edge_weight, entity_embed, *,
                        heads, pow_iter, alpha, att_dropout=0.0,
                        training=False):
    """Pallas implementation of PPRPowerIteration.forward (eval mode).

    edge_index:   int32 [2, E]   (row, col)
    edge_weight:  f32   [E, heads]
    entity_embed: f32   [N, dim]
    returns:      f32   [N, heads, dim]
    """
    n, dim = entity_embed.shape
    e = edge_index.shape[1]
    assert edge_weight.shape == (e, heads)
    # The lane-dense packed output and the in-kernel 128x128 transpose rely on:
    assert (heads * dim) % 128 == 0, "heads*dim must be a multiple of 128"
    assert n % 8 == 0, "N must be a multiple of the f32 sublane tile (8)"
    del att_dropout, training  # TODO(synk): training-mode edge dropout unimplemented.

    a_vals = (1.0 - alpha) * edge_weight      # [E, heads]  (O(E), tiny)

    # Densify the sparse adjacency per head, ALREADY TRANSPOSED (swap row/col
    # in the scatter -- zero extra cost):  adjT[h, col, row] += A[e, h].
    # Duplicate edges sum, matching torch_sparse.spmm.  Kept in f32.
    row, col = edge_index[0], edge_index[1]
    adj_t = jnp.zeros((heads, n, n), jnp.float32).at[:, col, row].add(a_vals.T)

    z0_t = entity_embed.T.astype(jnp.float32)  # [dim, N] lane-dense initial state

    kernel = functools.partial(_ppr_kernel, alpha=alpha, pow_iter=pow_iter,
                               heads=heads, dim=dim)

    out_flat = pl.pallas_call(
        kernel,
        out_shape=jax.ShapeDtypeStruct((n, heads * dim), entity_embed.dtype),
        grid=(1,),
        in_specs=[
            pl.BlockSpec((heads, n, n), lambda i: (0, 0, 0)),
            pl.BlockSpec((dim, n), lambda i: (0, 0)),
        ],
        out_specs=pl.BlockSpec((n, heads * dim), lambda i: (0, 0)),
        compiler_params=pltpu.CompilerParams(
            dimension_semantics=("arbitrary",),
            vmem_limit_bytes=32 * 1024 * 1024,   # footprint here is well under 1 MiB
        ),
    )(adj_t, z0_t)

    # [N, heads*dim] -> [N, heads, dim]: free reshape (no transpose over HBM).
    return out_flat.reshape(n, heads, dim)


def _reference_exact(edge_index, edge_weight, entity_embed, *,
                     heads, pow_iter, alpha):
    """Pure-JAX f32 reference matching the PyTorch module (eval mode)."""
    n = entity_embed.shape[0]
    a_vals = (1.0 - alpha) * edge_weight
    row, col = edge_index[0], edge_index[1]
    outs = []
    for h in range(heads):
        adj = jnp.zeros((n, n), jnp.float32).at[row, col].add(a_vals[:, h])
        z0 = entity_embed.astype(jnp.float32)
        z = z0
        for _ in range(pow_iter):
            z = jnp.dot(adj, z, precision=lax.Precision.HIGHEST) + alpha * z0
        outs.append(z[:, None, :])
    return jnp.concatenate(outs, axis=1)


if __name__ == "__main__":
    # Module hyperparameters (deterministic, in-script).
    DIM = 32
    HEADS = 4          # heads * dim = 128 -> lane-dense packed output
    POW_ITER = 3
    ALPHA = 0.1
    ATT_DROPOUT = 0.0  # eval-mode / no dropout so semantics are exact

    N = 128            # number of entities (graph nodes)
    E = 512            # number of edges

    key = jax.random.PRNGKey(0)
    k_ei, k_ew, k_emb = jax.random.split(key, 3)

    edge_index = jax.random.randint(k_ei, (2, E), 0, N, dtype=jnp.int32)
    edge_weight = jax.random.uniform(k_ew, (E, HEADS), dtype=jnp.float32)
    entity_embed = jax.random.normal(k_emb, (N, DIM), dtype=jnp.float32)

    out = ppr_power_iteration(
        edge_index, edge_weight, entity_embed,
        heads=HEADS, pow_iter=POW_ITER, alpha=ALPHA,
        att_dropout=ATT_DROPOUT, training=False)
    out = jax.block_until_ready(out)
    assert out.shape == (N, HEADS, DIM), out.shape

    # Check against the exact f32 PyTorch-equivalent reference.  Tolerance is
    # sized so the check passes even if the MXU's default f32 precision uses
    # per-pass bf16 quantization; structural/indexing bugs produce O(1) errors
    # and are still caught.
    ref_exact = _reference_exact(
        edge_index, edge_weight, entity_embed,
        heads=HEADS, pow_iter=POW_ITER, alpha=ALPHA)
    assert jnp.allclose(out, ref_exact, atol=1e-1, rtol=5e-2), \
        float(jnp.max(jnp.abs(out - ref_exact)))

    print("KERNEL_OK")
</pallas_src>

<mosaic_0001>
module attributes {stable_mosaic.version = 11 : i64} {
  func.func @_ppr_kernel(%arg0: i32, %arg1: memref<4x128x128xf32, #tpu.memory_space<vmem>>, %arg2: memref<32x128xf32, #tpu.memory_space<vmem>>, %arg3: memref<128x128xf32, #tpu.memory_space<vmem>>) attributes {dimension_semantics = [#tpu.dimension_semantics<arbitrary>], iteration_bounds = array<i64: 1>, scalar_prefetch = 0 : i64, scratch_operands = 0 : i64, tpu.core_type = #tpu.core_type<tc>, window_params = [{pipeline_mode = #tpu.pipeline_mode<synchronous>, transform_indices = @transform_0, window_bounds = array<i64: 4, 128, 128>}, {pipeline_mode = #tpu.pipeline_mode<synchronous>, transform_indices = @transform_1, window_bounds = array<i64: 32, 128>}, {pipeline_mode = #tpu.pipeline_mode<synchronous>, transform_indices = @transform_2, window_bounds = array<i64: 128, 128>}]} {
    %c0 = arith.constant 0 : index
    %c0_0 = arith.constant 0 : index
    %0 = vector.load %arg2[%c0, %c0_0] : memref<32x128xf32, #tpu.memory_space<vmem>>, vector<32x128xf32>
    %cst = arith.constant 1.000000e-01 : f32
    %1 = vector.broadcast %cst : f32 to vector<32x128xf32>
    %2 = arith.mulf %1, %0 : vector<32x128xf32>
    %c0_1 = arith.constant 0 : index
    %c0_2 = arith.constant 0 : index
    %c0_3 = arith.constant 0 : index
    %3 = vector.load %arg1[%c0_1, %c0_2, %c0_3] : memref<4x128x128xf32, #tpu.memory_space<vmem>>, vector<1x128x128xf32>
    %4 = vector.shape_cast %3 : vector<1x128x128xf32> to vector<128x128xf32>
    %cst_4 = arith.constant dense<0.000000e+00> : vector<32x128xf32>
    %5 = tpu.matmul %0, %4, %cst_4 {dimension_numbers = #tpu.dot_dimension_numbers<[1], [0], [0], [1], [0, 0, 1, 1], [], []>} : vector<32x128xf32>, vector<128x128xf32>, vector<32x128xf32> -> vector<32x128xf32>
    %6 = arith.addf %5, %2 : vector<32x128xf32>
    %cst_5 = arith.constant dense<0.000000e+00> : vector<32x128xf32>
    %7 = tpu.matmul %6, %4, %cst_5 {dimension_numbers = #tpu.dot_dimension_numbers<[1], [0], [0], [1], [0, 0, 1, 1], [], []>} : vector<32x128xf32>, vector<128x128xf32>, vector<32x128xf32> -> vector<32x128xf32>
    %8 = arith.addf %7, %2 : vector<32x128xf32>
    %cst_6 = arith.constant dense<0.000000e+00> : vector<32x128xf32>
    %9 = tpu.matmul %8, %4, %cst_6 {dimension_numbers = #tpu.dot_dimension_numbers<[1], [0], [0], [1], [0, 0, 1, 1], [], []>} : vector<32x128xf32>, vector<128x128xf32>, vector<32x128xf32> -> vector<32x128xf32>
    %10 = arith.addf %9, %2 : vector<32x128xf32>
    %c1 = arith.constant 1 : index
    %c0_7 = arith.constant 0 : index
    %c0_8 = arith.constant 0 : index
    %11 = vector.load %arg1[%c1, %c0_7, %c0_8] : memref<4x128x128xf32, #tpu.memory_space<vmem>>, vector<1x128x128xf32>
    %12 = vector.shape_cast %11 : vector<1x128x128xf32> to vector<128x128xf32>
    %cst_9 = arith.constant dense<0.000000e+00> : vector<32x128xf32>
    %13 = tpu.matmul %0, %12, %cst_9 {dimension_numbers = #tpu.dot_dimension_numbers<[1], [0], [0], [1], [0, 0, 1, 1], [], []>} : vector<32x128xf32>, vector<128x128xf32>, vector<32x128xf32> -> vector<32x128xf32>
    %14 = arith.addf %13, %2 : vector<32x128xf32>
    %cst_10 = arith.constant dense<0.000000e+00> : vector<32x128xf32>
    %15 = tpu.matmul %14, %12, %cst_10 {dimension_numbers = #tpu.dot_dimension_numbers<[1], [0], [0], [1], [0, 0, 1, 1], [], []>} : vector<32x128xf32>, vector<128x128xf32>, vector<32x128xf32> -> vector<32x128xf32>
    %16 = arith.addf %15, %2 : vector<32x128xf32>
    %cst_11 = arith.constant dense<0.000000e+00> : vector<32x128xf32>
    %17 = tpu.matmul %16, %12, %cst_11 {dimension_numbers = #tpu.dot_dimension_numbers<[1], [0], [0], [1], [0, 0, 1, 1], [], []>} : vector<32x128xf32>, vector<128x128xf32>, vector<32x128xf32> -> vector<32x128xf32>
    %18 = arith.addf %17, %2 : vector<32x128xf32>
    %c2 = arith.constant 2 : index
    %c0_12 = arith.constant 0 : index
    %c0_13 = arith.constant 0 : index
    %19 = vector.load %arg1[%c2, %c0_12, %c0_13] : memref<4x128x128xf32, #tpu.memory_space<vmem>>, vector<1x128x128xf32>
    %20 = vector.shape_cast %19 : vector<1x128x128xf32> to vector<128x128xf32>
    %cst_14 = arith.constant dense<0.000000e+00> : vector<32x128xf32>
    %21 = tpu.matmul %0, %20, %cst_14 {dimension_numbers = #tpu.dot_dimension_numbers<[1], [0], [0], [1], [0, 0, 1, 1], [], []>} : vector<32x128xf32>, vector<128x128xf32>, vector<32x128xf32> -> vector<32x128xf32>
    %22 = arith.addf %21, %2 : vector<32x128xf32>
    %cst_15 = arith.constant dense<0.000000e+00> : vector<32x128xf32>
    %23 = tpu.matmul %22, %20, %cst_15 {dimension_numbers = #tpu.dot_dimension_numbers<[1], [0], [0], [1], [0, 0, 1, 1], [], []>} : vector<32x128xf32>, vector<128x128xf32>, vector<32x128xf32> -> vector<32x128xf32>
    %24 = arith.addf %23, %2 : vector<32x128xf32>
    %cst_16 = arith.constant dense<0.000000e+00> : vector<32x128xf32>
    %25 = tpu.matmul %24, %20, %cst_16 {dimension_numbers = #tpu.dot_dimension_numbers<[1], [0], [0], [1], [0, 0, 1, 1], [], []>} : vector<32x128xf32>, vector<128x128xf32>, vector<32x128xf32> -> vector<32x128xf32>
    %26 = arith.addf %25, %2 : vector<32x128xf32>
    %c3 = arith.constant 3 : index
    %c0_17 = arith.constant 0 : index
    %c0_18 = arith.constant 0 : index
    %27 = vector.load %arg1[%c3, %c0_17, %c0_18] : memref<4x128x128xf32, #tpu.memory_space<vmem>>, vector<1x128x128xf32>
    %28 = vector.shape_cast %27 : vector<1x128x128xf32> to vector<128x128xf32>
    %cst_19 = arith.constant dense<0.000000e+00> : vector<32x128xf32>
    %29 = tpu.matmul %0, %28, %cst_19 {dimension_numbers = #tpu.dot_dimension_numbers<[1], [0], [0], [1], [0, 0, 1, 1], [], []>} : vector<32x128xf32>, vector<128x128xf32>, vector<32x128xf32> -> vector<32x128xf32>
    %30 = arith.addf %29, %2 : vector<32x128xf32>
    %cst_20 = arith.constant dense<0.000000e+00> : vector<32x128xf32>
    %31 = tpu.matmul %30, %28, %cst_20 {dimension_numbers = #tpu.dot_dimension_numbers<[1], [0], [0], [1], [0, 0, 1, 1], [], []>} : vector<32x128xf32>, vector<128x128xf32>, vector<32x128xf32> -> vector<32x128xf32>
    %32 = arith.addf %31, %2 : vector<32x128xf32>
    %cst_21 = arith.constant dense<0.000000e+00> : vector<32x128xf32>
    %33 = tpu.matmul %32, %28, %cst_21 {dimension_numbers = #tpu.dot_dimension_numbers<[1], [0], [0], [1], [0, 0, 1, 1], [], []>} : vector<32x128xf32>, vector<128x128xf32>, vector<32x128xf32> -> vector<32x128xf32>
    %34 = arith.addf %33, %2 : vector<32x128xf32>
    %35 = tpu.concatenate %10, %18, %26, %34 in 0 : vector<32x128xf32>, vector<32x128xf32>, vector<32x128xf32>, vector<32x128xf32> -> vector<128x128xf32>
    %36 = tpu.transpose %35, [1, 0] : vector<128x128xf32> -> vector<128x128xf32>
    %c0_22 = arith.constant 0 : index
    %c0_23 = arith.constant 0 : index
    %37 = vector.load %arg3[%c0_22, %c0_23] : memref<128x128xf32, #tpu.memory_space<vmem>>, vector<128x128xf32>
    tpu.vector_store %arg3[%c0_22, %c0_23], %36 {strides = array<i32>} : memref<128x128xf32, #tpu.memory_space<vmem>>, vector<128x128xf32>,
    return
  }
  func.func @transform_0(%arg0: i32) -> (i32, i32, i32) {
    %c0_i32 = arith.constant 0 : i32
    %c0_i32_0 = arith.constant 0 : i32
    %c0_i32_1 = arith.constant 0 : i32
    %c0_i32_2 = arith.constant 0 : i32
    return %c0_i32, %c0_i32_0, %c0_i32_1 : i32, i32, i32
  }
  func.func @transform_1(%arg0: i32) -> (i32, i32) {
    %c0_i32 = arith.constant 0 : i32
    %c0_i32_0 = arith.constant 0 : i32
    %c0_i32_1 = arith.constant 0 : i32
    return %c0_i32, %c0_i32_0 : i32, i32
  }
  func.func @transform_2(%arg0: i32) -> (i32, i32) {
    %c0_i32 = arith.constant 0 : i32
    %c0_i32_0 = arith.constant 0 : i32
    %c0_i32_1 = arith.constant 0 : i32
    return %c0_i32, %c0_i32_0 : i32, i32
  }
}

</mosaic_0001>

<bundles_post_ra>
// kernel: tpu_custom_call.1
= control target key start
LH: loop header
LB: loop body
LE: loop exit
PB: predicated region body
PF: predicated region fallthrough
CT: control target
= control target key end

     0   :  { %7 = vsyncpa [#allocation3], 0  ;;  %s2554_s0 = inlined_call_operand.hbm [shape: f32[4,128,128], index: 0, kind: input, shape index: {}]   ;;  %s2555_s1 = inlined_call_operand.hbm [shape: f32[32,128], index: 1, kind: input, shape index: {}]   ;;  %s2556_s2 = inlined_call_operand.hbm [shape: f32[128,128], index: 2, kind: output, shape index: {}]  }
   0x1   :  { %8 = vsyncpa [#allocation6], 0 }
   0x2   :  { %9 = vsyncpa [#allocation4], 0  ;;  %s1968_s9 = smov [#allocation2]  }
   0x3   :  { %s15_s10 = sshll.u32 %s1968_s9, 4  ;;  %s16_s10 = int_to_ptr.vmem [resolvable:$true] %s15_s10 }
   0x4   :  { %s1910_s11 = scalar_lea.vmem %s16_s10, 8192  ;;  %p1915_p1 = scmp.lt.s32.totalorder %s16_s10, %s16_s10 }
   0x5   :  { %p1911_p0 = scmp.ne.s32.totalorder %s16_s10, %s1910_s11  ;;  %p1916_p2 = scmp.lt.s32.totalorder %s1910_s11, %s1910_s11 }
   0x7   :  { %p1917_p3 = por %p1916_p2, %p1915_p1 }
   0x9   :  { %p1918_p4 = pnand %p1917_p3, %p1911_p0 }
   0xb   :  { %1921 = shalt.err (!%p1918_p4)
}
   0xc   :  { %s1969_s12 = smov 128   ;;  %s1970_s13 = smov 8  }
   0xd   :  { %21 = dma.hbm_to_vmem [thread:$0]  %s2554_s0, 8192, %s16_s10, [#allocation3], %s1969_s12, %s1969_s12, %s1970_s13  }
   0xe   :  { %s1971_s16 = smov [#allocation5]  }
   0xf   :  { %s27_s17 = sshll.u32 %s1971_s16, 4  ;;  %s28_s17 = int_to_ptr.vmem [resolvable:$true] %s27_s17 }
  0x10   :  { %s1930_s18 = scalar_lea.vmem %s28_s17, 512  ;;  %p1935_p6 = scmp.lt.s32.totalorder %s28_s17, %s28_s17 }
  0x11   :  { %p1931_p5 = scmp.ne.s32.totalorder %s28_s17, %s1930_s18  ;;  %p1936_p7 = scmp.lt.s32.totalorder %s1930_s18, %s1930_s18 }
  0x13   :  { %p1937_p8 = por %p1936_p7, %p1935_p6 }
  0x15   :  { %p1938_p9 = pnand %p1937_p8, %p1931_p5 }
  0x17   :  { %1941 = shalt.err (!%p1938_p9)
}
  0x18   :  { %33 = dma.hbm_to_vmem [thread:$0]  %s2555_s1, 512, %s28_s17, [#allocation6], %s1969_s12, %s1969_s12, %s1970_s13  }
  0x19   :  { %1962 = dma.done.wait [#allocation3], 8192  }
  0x1a   :  { %1963 = vsyncadd [#allocation3], 4294959104 }
  0x1b   :  { %1964 = dma.done.wait [#allocation6], 512  }
  0x1c   :  { %1965 = vsyncadd [#allocation6], 4294966784  ;;  %v2000_v0 = vld [vmem:[#allocation2 + $0x78] sm:$0xff]  ;;  %v2002_v1 = vld [vmem:[#allocation2 + $0x70] sm:$0xff]  ;;  %s1972_s0 = smov [#allocation7]  }
  0x1d   :  { %1441 = vmatprep.subr.mxu0 %v2000_v0  ;;  %1479 = vmatprep.subr.mxu1 %v2000_v0  ;;  %v2007_v2 = vld [vmem:[#allocation2 + $0x68] sm:$0xff]  ;;  %v2013_v3 = vld [vmem:[#allocation2 + $0x60] sm:$0xff]  ;;  %v2021_v5 = vld [vmem:[#allocation2 + $0x58] sm:$0xff]  ;;  %s1188_s1 = sshll.u32 %s1972_s0, 4  ;;  %s1189_s1 = int_to_ptr.vmem [resolvable:$true] %s1188_s1 }
  0x1e   :  { %1442 = vmatpush3.msra.mxu0 %v2000_v0  ;;  %1480 = vmatpush3.msra.mxu1 %v2000_v0  ;;  %v2017_v4 = vld [vmem:[#allocation5] sm:$0xff]  ;;  %v2027_v6 = vld [vmem:[#allocation2 + $0x50] sm:$0xff]  ;;  %v2033_v7 = vld [vmem:[#allocation2 + $0x48] sm:$0xff]  ;;  %s1942_s21 = scalar_lea.vmem %s1189_s1, 2048  ;;  %p1947_p11 = scmp.lt.s32.totalorder %s1189_s1, %s1189_s1 }
  0x1f   :  { %1443 = vmatprep.subr.mxu0 %v2002_v1  ;;  %1481 = vmatprep.subr.mxu1 %v2002_v1  ;;  %v2039_v8 = vld [vmem:[#allocation2 + $0x40] sm:$0xff]  ;;  %v2045_v9 = vld [vmem:[#allocation2 + $0x38] sm:$0xff]  ;;  %v2051_v10 = vld [vmem:[#allocation2 + $0x30] sm:$0xff]  ;;  %v2097_v21 = vmul.f32 0.1, %v2017_v4  ;;  %p1943_p10 = scmp.ne.s32.totalorder %s1189_s1, %s1942_s21  ;;  %p1948_p12 = scmp.lt.s32.totalorder %s1942_s21, %s1942_s21 }
  0x20   :  { %1444 = vmatpush3.msra.mxu0 %v2002_v1  ;;  %1482 = vmatpush3.msra.mxu1 %v2002_v1  ;;  %v53_v11 = vld [vmem:[#allocation2 + $0x28] sm:$0xff]  ;;  %v52_v12 = vld [vmem:[#allocation2 + $0x20] sm:$0xff]  ;;  %v51_v13 = vld [vmem:[#allocation2 + $0x18] sm:$0xff] }
  0x21   :  { %1445 = vmatprep.subr.mxu0 %v2007_v2  ;;  %1483 = vmatprep.subr.mxu1 %v2007_v2  ;;  %v50_v14 = vld [vmem:[#allocation2 + $0x10] sm:$0xff]  ;;  %v49_v15 = vld [vmem:[#allocation2 + $0x8] sm:$0xff]  ;;  %v48_v16 = vld [vmem:[#allocation2] sm:$0xff]  ;;  %p1949_p13 = por %p1948_p12, %p1947_p11 }
  0x22   :  { %1446 = vmatpush3.msra.mxu0 %v2007_v2  ;;  %1473 = vmatprep.mubr.f32.mxu0 %v2017_v4  ;;  %v2063_v17 = vld [vmem:[#allocation5 + $0x8] sm:$0xff]  ;;  %v2065_v18 = vld [vmem:[#allocation5 + $0x10] sm:$0xff]  ;;  %v2069_v19 = vld [vmem:[#allocation5 + $0x18] sm:$0xff] }
  0x23   :  { %1447 = vmatprep.subr.mxu0 %v2013_v3  ;;  %1484 = vmatpush3.msra.mxu1 %v2007_v2  ;;  %v2092_v20 = vld [vmem:[#allocation2 + $0xf8] sm:$0xff]  ;;  %v2100_v22 = vmul.f32 0.1, %v2063_v17  ;;  %v2103_v24 = vmul.f32 0.1, %v2069_v19  ;;  %v2110_v30 = vld [vmem:[#allocation2 + $0xf0] sm:$0xff]  ;;  %p1950_p0 = pnand %p1949_p13, %p1943_p10 }
  0x24   :  { %1448 = vmatpush3.msra.mxu0 %v2013_v3  ;;  %1485 = vmatprep.subr.mxu1 %v2013_v3  ;;  %v2106_v26 = vmul.f32 0.1, %v2065_v18  ;;  %v2114_v33 = vld [vmem:[#allocation2 + $0xe8] sm:$0xff]  ;;  %v2119_v35 = vld [vmem:[#allocation2 + $0xe0] sm:$0xff]  ;;  %v2123_v36 = vld [vmem:[#allocation2 + $0xd8] sm:$0xff] }
  0x25   :  { %1449 = vmatprep.subr.mxu0 %v2021_v5  ;;  %1486 = vmatpush3.msra.mxu1 %v2013_v3  ;;  %v2128_v37 = vld [vmem:[#allocation2 + $0xd0] sm:$0xff]  ;;  %v2132_v38 = vld [vmem:[#allocation2 + $0xc8] sm:$0xff]  ;;  %v2136_v39 = vld [vmem:[#allocation2 + $0xc0] sm:$0xff] }
  0x26   :  { %1450 = vmatpush3.msra.mxu0 %v2021_v5  ;;  %1487 = vmatprep.subr.mxu1 %v2021_v5  ;;  %v2140_v40 = vld [vmem:[#allocation2 + $0xb8] sm:$0xff]  ;;  %v2144_v41 = vld [vmem:[#allocation2 + $0xb0] sm:$0xff]  ;;  %v2148_v42 = vld [vmem:[#allocation2 + $0xa8] sm:$0xff] }
  0x27   :  { %1451 = vmatprep.subr.mxu0 %v2027_v6  ;;  %1488 = vmatpush3.msra.mxu1 %v2021_v5  ;;  %v2152_v43 = vld [vmem:[#allocation2 + $0xa0] sm:$0xff]  ;;  %v2156_v44 = vld [vmem:[#allocation2 + $0x98] sm:$0xff]  ;;  %v2160_v45 = vld [vmem:[#allocation2 + $0x90] sm:$0xff] }
  0x28   :  { %1452 = vmatpush3.msra.mxu0 %v2027_v6  ;;  %1489 = vmatprep.subr.mxu1 %v2027_v6  ;;  %v2164_v46 = vld [vmem:[#allocation2 + $0x88] sm:$0xff]  ;;  %v2168_v47 = vld [vmem:[#allocation2 + $0x80] sm:$0xff]  ;;  %v2209_v48 = vld [vmem:[#allocation2 + $0x178] sm:$0xff] }
  0x29   :  { %1453 = vmatprep.subr.mxu0 %v2033_v7  ;;  %1490 = vmatpush3.msra.mxu1 %v2027_v6  ;;  %v2249_v62 = vld [vmem:[#allocation2 + $0x170] sm:$0xff] }
  0x2a   :  { %1454 = vmatpush3.msra.mxu0 %v2033_v7  ;;  %1491 = vmatprep.subr.mxu1 %v2033_v7 }
  0x2b   :  { %1455 = vmatprep.subr.mxu0 %v2039_v8  ;;  %1492 = vmatpush3.msra.mxu1 %v2033_v7 }
  0x2c   :  { %1456 = vmatpush3.msra.mxu0 %v2039_v8  ;;  %1493 = vmatprep.subr.mxu1 %v2039_v8 }
  0x2d   :  { %1457 = vmatprep.subr.mxu0 %v2045_v9  ;;  %1494 = vmatpush3.msra.mxu1 %v2039_v8 }
  0x2e   :  { %1458 = vmatpush3.msra.mxu0 %v2045_v9  ;;  %1495 = vmatprep.subr.mxu1 %v2045_v9 }
  0x2f   :  { %1459 = vmatprep.subr.mxu0 %v2051_v10  ;;  %1496 = vmatpush3.msra.mxu1 %v2045_v9 }
  0x30   :  { %1460 = vmatpush3.msra.mxu0 %v2051_v10  ;;  %1497 = vmatprep.subr.mxu1 %v2051_v10 }
  0x31   :  { %1461 = vmatprep.subr.mxu0 %v53_v11  ;;  %1498 = vmatpush3.msra.mxu1 %v2051_v10 }
  0x32   :  { %1462 = vmatpush3.msra.mxu0 %v53_v11  ;;  %1499 = vmatprep.subr.mxu1 %v53_v11 }
  0x33   :  { %1463 = vmatprep.subr.mxu0 %v52_v12  ;;  %1500 = vmatpush3.msra.mxu1 %v53_v11 }
  0x34   :  { %1464 = vmatpush3.msra.mxu0 %v52_v12  ;;  %1501 = vmatprep.subr.mxu1 %v52_v12 }
  0x35   :  { %1465 = vmatprep.subr.mxu0 %v51_v13  ;;  %1502 = vmatpush3.msra.mxu1 %v52_v12 }
  0x36   :  { %1466 = vmatpush3.msra.mxu0 %v51_v13  ;;  %1503 = vmatprep.subr.mxu1 %v51_v13 }
  0x37   :  { %1467 = vmatprep.subr.mxu0 %v50_v14  ;;  %1504 = vmatpush3.msra.mxu1 %v51_v13 }
  0x38   :  { %1468 = vmatpush3.msra.mxu0 %v50_v14  ;;  %1505 = vmatprep.subr.mxu1 %v50_v14 }
  0x39   :  { %1469 = vmatprep.subr.mxu0 %v49_v15  ;;  %1506 = vmatpush3.msra.mxu1 %v50_v14 }
  0x3a   :  { %1470 = vmatpush3.msra.mxu0 %v49_v15  ;;  %1507 = vmatprep.subr.mxu1 %v49_v15 }
  0x3b   :  { %1471 = vmatprep.subr.mxu0 %v48_v16  ;;  %1508 = vmatpush3.msra.mxu1 %v49_v15 }
  0x3c   :  { %1472 = vmatpush3.msra.mxu0 %v48_v16  ;;  %1509 = vmatprep.subr.mxu1 %v48_v16 }
  0x3d   :  { %1474 = vmatmul.mubr.f32.vlgmr.msra.gmra.mxu0 %v2063_v17  ;;  %1510 = vmatpush3.msra.mxu1 %v48_v16 }
  0x3e   :  { %1476 = vmatprep.mubr.f32.mxu0 %v2065_v18  ;;  %1517 = vmatprep.subr.mxu0 %v2000_v0 }
  0x3f   :  { %1518 = vmatpush3.msra.mxu0 %v2000_v0  ;;  %1555 = vmatprep.subr.mxu1 %v2092_v20 }
  0x40   :  { %1519 = vmatprep.subr.mxu0 %v2002_v1 }
  0x41   :  { %1477 = vmatmul.mubr.f32.gmra.mxu0 %v2069_v19 }
  0x42   :  { %1520 = vmatpush3.msra.mxu0 %v2002_v1  ;;  %v2254_v1 = vld [vmem:[#allocation2 + $0x168] sm:$0xff] }
  0x43   :  { %1521 = vmatprep.subr.mxu0 %v2007_v2 }
  0x44   :  { %1522 = vmatpush3.msra.mxu0 %v2007_v2 }
  0x45   :  { %1523 = vmatprep.subr.mxu0 %v2013_v3 }
  0x46   :  { %1524 = vmatpush3.msra.mxu0 %v2013_v3  ;;  %v2259_v3 = vld [vmem:[#allocation2 + $0x160] sm:$0xff] }
  0x47   :  { %1525 = vmatprep.subr.mxu0 %v2021_v5 }
  0x48   :  { %1526 = vmatpush3.msra.mxu0 %v2021_v5  ;;  %v2263_v5 = vld [vmem:[#allocation2 + $0x158] sm:$0xff] }
  0x49   :  { %1527 = vmatprep.subr.mxu0 %v2027_v6 }
  0x4a   :  { %1528 = vmatpush3.msra.mxu0 %v2027_v6  ;;  %v2268_v6 = vld [vmem:[#allocation2 + $0x150] sm:$0xff] }
  0x4b   :  { %1529 = vmatprep.subr.mxu0 %v2033_v7 }
  0x4c   :  { %1530 = vmatpush3.msra.mxu0 %v2033_v7  ;;  %v2272_v7 = vld [vmem:[#allocation2 + $0x148] sm:$0xff] }
  0x4d   :  { %1531 = vmatprep.subr.mxu0 %v2039_v8 }
  0x4e   :  { %1532 = vmatpush3.msra.mxu0 %v2039_v8  ;;  %v2276_v8 = vld [vmem:[#allocation2 + $0x140] sm:$0xff] }
  0x4f   :  { %1533 = vmatprep.subr.mxu0 %v2045_v9 }
  0x50   :  { %1534 = vmatpush3.msra.mxu0 %v2045_v9  ;;  %v2280_v9 = vld [vmem:[#allocation2 + $0x138] sm:$0xff] }
  0x51   :  { %1535 = vmatprep.subr.mxu0 %v2051_v10 }
  0x52   :  { %1536 = vmatpush3.msra.mxu0 %v2051_v10  ;;  %v2284_v10 = vld [vmem:[#allocation2 + $0x130] sm:$0xff] }
  0x53   :  { %1537 = vmatprep.subr.mxu0 %v53_v11 }
  0x54   :  { %1538 = vmatpush3.msra.mxu0 %v53_v11  ;;  %v2288_v11 = vld [vmem:[#allocation2 + $0x128] sm:$0xff] }
  0x55   :  { %1539 = vmatprep.subr.mxu0 %v52_v12 }
  0x56   :  { %1540 = vmatpush3.msra.mxu0 %v52_v12  ;;  %v2292_v12 = vld [vmem:[#allocation2 + $0x120] sm:$0xff] }
  0x57   :  { %1541 = vmatprep.subr.mxu0 %v51_v13 }
  0x58   :  { %1542 = vmatpush3.msra.mxu0 %v51_v13  ;;  %v2296_v13 = vld [vmem:[#allocation2 + $0x118] sm:$0xff] }
  0x59   :  { %1543 = vmatprep.subr.mxu0 %v50_v14 }
  0x5a   :  { %1544 = vmatpush3.msra.mxu0 %v50_v14  ;;  %v2300_v14 = vld [vmem:[#allocation2 + $0x110] sm:$0xff] }
  0x5b   :  { %1545 = vmatprep.subr.mxu0 %v49_v15 }
  0x5c   :  { %1546 = vmatpush3.msra.mxu0 %v49_v15  ;;  %v2304_v15 = vld [vmem:[#allocation2 + $0x108] sm:$0xff] }
  0x5d   :  { %1547 = vmatprep.subr.mxu0 %v48_v16 }
  0x5e   :  { %1548 = vmatpush3.msra.mxu0 %v48_v16  ;;  %v2308_v16 = vld [vmem:[#allocation2 + $0x100] sm:$0xff] }
  0x5f   :  { %1593 = vmatprep.subr.mxu0 %v2092_v20 }
  0xfd   :  { %v1475_v23 = vpop.f32.mrf.mxu0 }
  0xfe   :  { %v136_v28 = vadd.f32 %v1475_v23, %v2100_v22 }
  0xff   :  { %v130_v25 = vpop.f32.mrf.mxu0 }
 0x100   :  { %v131_v27 = vadd.f32 %v130_v25, %v2097_v21 }
 0x101   :  { %v1478_v29 = vpop.f32.mrf.mxu0 }
 0x102   :  { %1511 = vmatprep.mubr.f32.mxu1 %v131_v27  ;;  %v146_v31 = vadd.f32 %v1478_v29, %v2103_v24 }
 0x103   :  { %1512 = vmatmul.mubr.f32.vlgmr.msra.gmra.mxu1 %v136_v28  ;;  %v140_v32 = vpop.f32.mrf.mxu0 }
 0x104   :  { %1556 = vmatpush3.msra.mxu1 %v2092_v20  ;;  %v141_v34 = vadd.f32 %v140_v32, %v2106_v26 }
 0x105   :  { %1557 = vmatprep.subr.mxu1 %v2110_v30 }
 0x106   :  { %1558 = vmatpush3.msra.mxu1 %v2110_v30  ;;  %1514 = vmatprep.mubr.f32.mxu1 %v141_v34 }
 0x107   :  { %1559 = vmatprep.subr.mxu1 %v2114_v33  ;;  %1515 = vmatmul.mubr.f32.gmra.mxu1 %v146_v31 }
 0x108   :  { %1560 = vmatpush3.msra.mxu1 %v2114_v33  ;;  %1587 = vmatprep.mubr.f32.mxu1 %v2017_v4 }
 0x109   :  { %1561 = vmatprep.subr.mxu1 %v2119_v35 }
 0x10a   :  { %1562 = vmatpush3.msra.mxu1 %v2119_v35 }
 0x10b   :  { %1563 = vmatprep.subr.mxu1 %v2123_v36 }
 0x10c   :  { %1564 = vmatpush3.msra.mxu1 %v2123_v36 }
 0x10d   :  { %1565 = vmatprep.subr.mxu1 %v2128_v37 }
 0x10e   :  { %1566 = vmatpush3.msra.mxu1 %v2128_v37 }
 0x10f   :  { %1567 = vmatprep.subr.mxu1 %v2132_v38 }
 0x110   :  { %1568 = vmatpush3.msra.mxu1 %v2132_v38 }
 0x111   :  { %1569 = vmatprep.subr.mxu1 %v2136_v39 }
 0x112   :  { %1570 = vmatpush3.msra.mxu1 %v2136_v39 }
 0x113   :  { %1571 = vmatprep.subr.mxu1 %v2140_v40 }
 0x114   :  { %1572 = vmatpush3.msra.mxu1 %v2140_v40 }
 0x115   :  { %1573 = vmatprep.subr.mxu1 %v2144_v41 }
 0x116   :  { %1574 = vmatpush3.msra.mxu1 %v2144_v41 }
 0x117   :  { %1575 = vmatprep.subr.mxu1 %v2148_v42 }
 0x118   :  { %1576 = vmatpush3.msra.mxu1 %v2148_v42 }
 0x119   :  { %1577 = vmatprep.subr.mxu1 %v2152_v43 }
 0x11a   :  { %1578 = vmatpush3.msra.mxu1 %v2152_v43 }
 0x11b   :  { %1579 = vmatprep.subr.mxu1 %v2156_v44 }
 0x11c   :  { %1580 = vmatpush3.msra.mxu1 %v2156_v44 }
 0x11d   :  { %1581 = vmatprep.subr.mxu1 %v2160_v45 }
 0x11e   :  { %1582 = vmatpush3.msra.mxu1 %v2160_v45 }
 0x11f   :  { %1583 = vmatprep.subr.mxu1 %v2164_v46 }
 0x120   :  { %1584 = vmatpush3.msra.mxu1 %v2164_v46 }
 0x121   :  { %1585 = vmatprep.subr.mxu1 %v2168_v47 }
 0x122   :  { %1586 = vmatpush3.msra.mxu1 %v2168_v47 }
 0x123   :  { %1588 = vmatmul.mubr.f32.vlgmr.msra.gmra.mxu1 %v2063_v17  ;;  %1631 = vmatprep.subr.mxu1 %v2092_v20 }
 0x124   :  { %1590 = vmatprep.mubr.f32.mxu1 %v2065_v18  ;;  %1632 = vmatpush3.msra.mxu1 %v2092_v20 }
 0x125   :  { %1633 = vmatprep.subr.mxu1 %v2110_v30 }
 0x126   :  { %1634 = vmatpush3.msra.mxu1 %v2110_v30 }
 0x127   :  { %1591 = vmatmul.mubr.f32.gmra.mxu1 %v2069_v19  ;;  %1635 = vmatprep.subr.mxu1 %v2114_v33 }
 0x128   :  { %1636 = vmatpush3.msra.mxu1 %v2114_v33 }
 0x129   :  { %1637 = vmatprep.subr.mxu1 %v2119_v35 }
 0x12a   :  { %1638 = vmatpush3.msra.mxu1 %v2119_v35 }
 0x12b   :  { %1639 = vmatprep.subr.mxu1 %v2123_v36 }
 0x12c   :  { %1640 = vmatpush3.msra.mxu1 %v2123_v36 }
 0x12d   :  { %1641 = vmatprep.subr.mxu1 %v2128_v37 }
 0x12e   :  { %1642 = vmatpush3.msra.mxu1 %v2128_v37 }
 0x12f   :  { %1643 = vmatprep.subr.mxu1 %v2132_v38 }
 0x130   :  { %1644 = vmatpush3.msra.mxu1 %v2132_v38 }
 0x131   :  { %1645 = vmatprep.subr.mxu1 %v2136_v39 }
 0x132   :  { %1646 = vmatpush3.msra.mxu1 %v2136_v39 }
 0x133   :  { %1647 = vmatprep.subr.mxu1 %v2140_v40 }
 0x134   :  { %1648 = vmatpush3.msra.mxu1 %v2140_v40 }
 0x135   :  { %1649 = vmatprep.subr.mxu1 %v2144_v41 }
 0x136   :  { %1650 = vmatpush3.msra.mxu1 %v2144_v41 }
 0x137   :  { %1651 = vmatprep.subr.mxu1 %v2148_v42 }
 0x138   :  { %1652 = vmatpush3.msra.mxu1 %v2148_v42 }
 0x139   :  { %1653 = vmatprep.subr.mxu1 %v2152_v43 }
 0x13a   :  { %1654 = vmatpush3.msra.mxu1 %v2152_v43 }
 0x13b   :  { %1655 = vmatprep.subr.mxu1 %v2156_v44 }
 0x13c   :  { %1656 = vmatpush3.msra.mxu1 %v2156_v44 }
 0x13d   :  { %1657 = vmatprep.subr.mxu1 %v2160_v45 }
 0x13e   :  { %1658 = vmatpush3.msra.mxu1 %v2160_v45 }
 0x13f   :  { %1659 = vmatprep.subr.mxu1 %v2164_v46 }
 0x140   :  { %1660 = vmatpush3.msra.mxu1 %v2164_v46 }
 0x141   :  { %1661 = vmatprep.subr.mxu1 %v2168_v47 }
 0x142   :  { %1662 = vmatpush3.msra.mxu1 %v2168_v47 }
 0x143   :  { %1707 = vmatprep.subr.mxu1 %v2209_v48 }
 0x1c3   :  { %v1513_v49 = vpop.f32.mrf.mxu1 }
 0x1c4   :  { %v221_v52 = vadd.f32 %v1513_v49, %v2100_v22  ;;  %v2398_v49 = vld [vmem:[#allocation2 + $0x1e8] sm:$0xff] }
 0x1c5   :  { %v215_v50 = vpop.f32.mrf.mxu1 }
 0x1c6   :  { %v216_v51 = vadd.f32 %v215_v50, %v2097_v21 }
 0x1c7   :  { %v1516_v53 = vpop.f32.mrf.mxu1 }
 0x1c8   :  { %1549 = vmatprep.mubr.f32.mxu0 %v216_v51  ;;  %v231_v54 = vadd.f32 %v1516_v53, %v2103_v24  ;;  %v2403_v51 = vld [vmem:[#allocation2 + $0x1e0] sm:$0xff]  ;;  %v2412_v53 = vld [vmem:[#allocation2 + $0x1d0] sm:$0xff] }
 0x1c9   :  { %1550 = vmatmul.mubr.f32.vlgmr.msra.gmra.mxu0 %v221_v52  ;;  %v225_v55 = vpop.f32.mrf.mxu1  ;;  %v2407_v52 = vld [vmem:[#allocation2 + $0x1d8] sm:$0xff] }
 0x1ca   :  { %1594 = vmatpush3.msra.mxu0 %v2092_v20  ;;  %v226_v56 = vadd.f32 %v225_v55, %v2106_v26  ;;  %v2349_v20 = vld [vmem:[#allocation2 + $0x1f8] sm:$0xff]  ;;  %v2420_v55 = vld [vmem:[#allocation2 + $0x1c0] sm:$0xff] }
 0x1cb   :  { %1595 = vmatprep.subr.mxu0 %v2110_v30 }
 0x1cc   :  { %1596 = vmatpush3.msra.mxu0 %v2110_v30  ;;  %1552 = vmatprep.mubr.f32.mxu0 %v226_v56  ;;  %v2428_v56 = vld [vmem:[#allocation2 + $0x1b0] sm:$0xff] }
 0x1cd   :  { %1597 = vmatprep.subr.mxu0 %v2114_v33  ;;  %1553 = vmatmul.mubr.f32.gmra.mxu0 %v231_v54  ;;  %v2416_v54 = vld [vmem:[#allocation2 + $0x1c8] sm:$0xff] }
 0x1ce   :  { %1598 = vmatpush3.msra.mxu0 %v2114_v33 }
 0x1cf   :  { %1599 = vmatprep.subr.mxu0 %v2119_v35 }
 0x1d0   :  { %1600 = vmatpush3.msra.mxu0 %v2119_v35 }
 0x1d1   :  { %1601 = vmatprep.subr.mxu0 %v2123_v36 }
 0x1d2   :  { %1602 = vmatpush3.msra.mxu0 %v2123_v36 }
 0x1d3   :  { %1603 = vmatprep.subr.mxu0 %v2128_v37 }
 0x1d4   :  { %1604 = vmatpush3.msra.mxu0 %v2128_v37 }
 0x1d5   :  { %1605 = vmatprep.subr.mxu0 %v2132_v38 }
 0x1d6   :  { %1606 = vmatpush3.msra.mxu0 %v2132_v38 }
 0x1d7   :  { %1607 = vmatprep.subr.mxu0 %v2136_v39 }
 0x1d8   :  { %1608 = vmatpush3.msra.mxu0 %v2136_v39 }
 0x1d9   :  { %1609 = vmatprep.subr.mxu0 %v2140_v40 }
 0x1da   :  { %1610 = vmatpush3.msra.mxu0 %v2140_v40 }
 0x1db   :  { %1611 = vmatprep.subr.mxu0 %v2144_v41 }
 0x1dc   :  { %1612 = vmatpush3.msra.mxu0 %v2144_v41 }
 0x1dd   :  { %1613 = vmatprep.subr.mxu0 %v2148_v42 }
 0x1de   :  { %1614 = vmatpush3.msra.mxu0 %v2148_v42 }
 0x1df   :  { %1615 = vmatprep.subr.mxu0 %v2152_v43 }
 0x1e0   :  { %1616 = vmatpush3.msra.mxu0 %v2152_v43 }
 0x1e1   :  { %1617 = vmatprep.subr.mxu0 %v2156_v44 }
 0x1e2   :  { %1618 = vmatpush3.msra.mxu0 %v2156_v44 }
 0x1e3   :  { %v1589_v57 = vpop.f32.mrf.mxu1  ;;  %1619 = vmatprep.subr.mxu0 %v2160_v45 }
 0x1e4   :  { %1620 = vmatpush3.msra.mxu0 %v2160_v45  ;;  %v408_v60 = vadd.f32 %v1589_v57, %v2100_v22  ;;  %v2432_v57 = vld [vmem:[#allocation2 + $0x1a8] sm:$0xff] }
 0x1e5   :  { %v402_v58 = vpop.f32.mrf.mxu1  ;;  %1621 = vmatprep.subr.mxu0 %v2164_v46 }
 0x1e6   :  { %v403_v59 = vadd.f32 %v402_v58, %v2097_v21  ;;  %1622 = vmatpush3.msra.mxu0 %v2164_v46  ;;  %v2393_v46 = vld [vmem:[#allocation2 + $0x1f0] sm:$0xff]  ;;  %v2436_v58 = vld [vmem:[#allocation2 + $0x1a0] sm:$0xff] }
 0x1e7   :  { %1623 = vmatprep.subr.mxu0 %v2168_v47  ;;  %v1592_v61 = vpop.f32.mrf.mxu1 }
 0x1e8   :  { %1624 = vmatpush3.msra.mxu0 %v2168_v47  ;;  %1625 = vmatprep.mubr.f32.mxu0 %v403_v59  ;;  %v418_v63 = vadd.f32 %v1592_v61, %v2103_v24  ;;  %v2440_v59 = vld [vmem:[#allocation2 + $0x198] sm:$0xff]  ;;  %v2448_v61 = vld [vmem:[#allocation2 + $0x188] sm:$0xff] }
 0x1e9   :  { %1626 = vmatmul.mubr.f32.vlgmr.msra.gmra.mxu0 %v408_v60  ;;  %1669 = vmatprep.subr.mxu0 %v2209_v48  ;;  %v412_v0 = vpop.f32.mrf.mxu1  ;;  %v2444_v60 = vld [vmem:[#allocation2 + $0x190] sm:$0xff] }
 0x1ea   :  { %1670 = vmatpush3.msra.mxu0 %v2209_v48  ;;  %v413_v2 = vadd.f32 %v412_v0, %v2106_v26 }
 0x1eb   :  { %1671 = vmatprep.subr.mxu0 %v2249_v62 }
 0x1ec   :  { %1672 = vmatpush3.msra.mxu0 %v2249_v62  ;;  %1628 = vmatprep.mubr.f32.mxu0 %v413_v2 }
 0x1ed   :  { %1673 = vmatprep.subr.mxu0 %v2254_v1  ;;  %1629 = vmatmul.mubr.f32.gmra.mxu0 %v418_v63 }
 0x1ee   :  { %1674 = vmatpush3.msra.mxu0 %v2254_v1  ;;  %1701 = vmatprep.mubr.f32.mxu0 %v2017_v4 }
 0x1ef   :  { %1675 = vmatprep.subr.mxu0 %v2259_v3 }
 0x1f0   :  { %1676 = vmatpush3.msra.mxu0 %v2259_v3 }
 0x1f1   :  { %1677 = vmatprep.subr.mxu0 %v2263_v5 }
 0x1f2   :  { %1678 = vmatpush3.msra.mxu0 %v2263_v5 }
 0x1f3   :  { %1679 = vmatprep.subr.mxu0 %v2268_v6 }
 0x1f4   :  { %1680 = vmatpush3.msra.mxu0 %v2268_v6 }
 0x1f5   :  { %1681 = vmatprep.subr.mxu0 %v2272_v7 }
 0x1f6   :  { %1682 = vmatpush3.msra.mxu0 %v2272_v7 }
 0x1f7   :  { %1683 = vmatprep.subr.mxu0 %v2276_v8 }
 0x1f8   :  { %1684 = vmatpush3.msra.mxu0 %v2276_v8 }
 0x1f9   :  { %1685 = vmatprep.subr.mxu0 %v2280_v9 }
 0x1fa   :  { %1686 = vmatpush3.msra.mxu0 %v2280_v9 }
 0x1fb   :  { %1687 = vmatprep.subr.mxu0 %v2284_v10 }
 0x1fc   :  { %1688 = vmatpush3.msra.mxu0 %v2284_v10 }
 0x1fd   :  { %1689 = vmatprep.subr.mxu0 %v2288_v11 }
 0x1fe   :  { %1690 = vmatpush3.msra.mxu0 %v2288_v11 }
 0x1ff   :  { %1691 = vmatprep.subr.mxu0 %v2292_v12 }
 0x200   :  { %1692 = vmatpush3.msra.mxu0 %v2292_v12 }
 0x201   :  { %1693 = vmatprep.subr.mxu0 %v2296_v13 }
 0x202   :  { %1694 = vmatpush3.msra.mxu0 %v2296_v13 }
 0x203   :  { %1695 = vmatprep.subr.mxu0 %v2300_v14 }
 0x204   :  { %1696 = vmatpush3.msra.mxu0 %v2300_v14 }
 0x205   :  { %1697 = vmatprep.subr.mxu0 %v2304_v15 }
 0x206   :  { %1698 = vmatpush3.msra.mxu0 %v2304_v15 }
 0x207   :  { %1699 = vmatprep.subr.mxu0 %v2308_v16 }
 0x208   :  { %1700 = vmatpush3.msra.mxu0 %v2308_v16 }
 0x209   :  { %1702 = vmatmul.mubr.f32.vlgmr.msra.gmra.mxu0 %v2063_v17  ;;  %1745 = vmatprep.subr.mxu0 %v2209_v48 }
 0x20a   :  { %1704 = vmatprep.mubr.f32.mxu0 %v2065_v18  ;;  %1746 = vmatpush3.msra.mxu0 %v2209_v48 }
 0x20b   :  { %1747 = vmatprep.subr.mxu0 %v2249_v62 }
 0x20c   :  { %1748 = vmatpush3.msra.mxu0 %v2249_v62 }
 0x20d   :  { %1705 = vmatmul.mubr.f32.gmra.mxu0 %v2069_v19  ;;  %1749 = vmatprep.subr.mxu0 %v2254_v1 }
 0x20e   :  { %1750 = vmatpush3.msra.mxu0 %v2254_v1 }
 0x20f   :  { %1751 = vmatprep.subr.mxu0 %v2259_v3 }
 0x210   :  { %1752 = vmatpush3.msra.mxu0 %v2259_v3 }
 0x211   :  { %1753 = vmatprep.subr.mxu0 %v2263_v5 }
 0x212   :  { %1754 = vmatpush3.msra.mxu0 %v2263_v5 }
 0x213   :  { %1755 = vmatprep.subr.mxu0 %v2268_v6 }
 0x214   :  { %1756 = vmatpush3.msra.mxu0 %v2268_v6 }
 0x215   :  { %1757 = vmatprep.subr.mxu0 %v2272_v7 }
 0x216   :  { %1758 = vmatpush3.msra.mxu0 %v2272_v7 }
 0x217   :  { %1759 = vmatprep.subr.mxu0 %v2276_v8 }
 0x218   :  { %1760 = vmatpush3.msra.mxu0 %v2276_v8 }
 0x219   :  { %1761 = vmatprep.subr.mxu0 %v2280_v9 }
 0x21a   :  { %1762 = vmatpush3.msra.mxu0 %v2280_v9 }
 0x21b   :  { %1763 = vmatprep.subr.mxu0 %v2284_v10 }
 0x21c   :  { %1764 = vmatpush3.msra.mxu0 %v2284_v10 }
 0x21d   :  { %1765 = vmatprep.subr.mxu0 %v2288_v11 }
 0x21e   :  { %1766 = vmatpush3.msra.mxu0 %v2288_v11 }
 0x21f   :  { %1767 = vmatprep.subr.mxu0 %v2292_v12 }
 0x220   :  { %1768 = vmatpush3.msra.mxu0 %v2292_v12 }
 0x221   :  { %1769 = vmatprep.subr.mxu0 %v2296_v13 }
 0x222   :  { %1770 = vmatpush3.msra.mxu0 %v2296_v13 }
 0x223   :  { %1771 = vmatprep.subr.mxu0 %v2300_v14 }
 0x224   :  { %1772 = vmatpush3.msra.mxu0 %v2300_v14 }
 0x225   :  { %1773 = vmatprep.subr.mxu0 %v2304_v15 }
 0x226   :  { %1774 = vmatpush3.msra.mxu0 %v2304_v15 }
 0x227   :  { %1775 = vmatprep.subr.mxu0 %v2308_v16 }
 0x228   :  { %1776 = vmatpush3.msra.mxu0 %v2308_v16 }
 0x229   :  { %1821 = vmatprep.subr.mxu0 %v2349_v20 }
 0x289   :  { %v1551_v23 = vpop.f32.mrf.mxu0 }
 0x28a   :  { %v306_v30 = vadd.f32 %v1551_v23, %v2100_v22 }
 0x28b   :  { %v300_v25 = vpop.f32.mrf.mxu0 }
 0x28c   :  { %v301_v27 = vadd.f32 %v300_v25, %v2097_v21 }
 0x28d   :  { %v1554_v28 = vpop.f32.mrf.mxu0 }
 0x28e   :  { %1135 = vxpose.xlu0.b32.start [1/16] %v301_v27, 128  ;;  %v316_v32 = vadd.f32 %v1554_v28, %v2103_v24 }
 0x28f   :  { %v310_v29 = vpop.f32.mrf.mxu0 }
 0x290   :  { %v311_v31 = vadd.f32 %v310_v29, %v2106_v26 }
 0x292   :  { %1136 = vxpose.xlu0.b32.cont [2/16] %v306_v30, 128 }
 0x296   :  { %1137 = vxpose.xlu0.b32.cont [3/16] %v311_v31, 128 }
 0x29a   :  { %1138 = vxpose.xlu0.b32.cont [4/16] %v316_v32, 128 }
 0x2a9   :  { %v1627_v33 = vpop.f32.mrf.mxu0 }
 0x2aa   :  { %v493_v36 = vadd.f32 %v1627_v33, %v2100_v22 }
 0x2ab   :  { %v487_v34 = vpop.f32.mrf.mxu0 }
 0x2ac   :  { %v488_v35 = vadd.f32 %v487_v34, %v2097_v21 }
 0x2ad   :  { %v1630_v37 = vpop.f32.mrf.mxu0 }
 0x2ae   :  { %1663 = vmatprep.mubr.f32.mxu1 %v488_v35  ;;  %v503_v38 = vadd.f32 %v1630_v37, %v2103_v24 }
 0x2af   :  { %1664 = vmatmul.mubr.f32.vlgmr.msra.gmra.mxu1 %v493_v36  ;;  %v497_v39 = vpop.f32.mrf.mxu0 }
 0x2b0   :  { %1708 = vmatpush3.msra.mxu1 %v2209_v48  ;;  %v498_v40 = vadd.f32 %v497_v39, %v2106_v26 }
 0x2b1   :  { %1709 = vmatprep.subr.mxu1 %v2249_v62 }
 0x2b2   :  { %1710 = vmatpush3.msra.mxu1 %v2249_v62  ;;  %1666 = vmatprep.mubr.f32.mxu1 %v498_v40  ;;  %v2452_v62 = vld [vmem:[#allocation2 + $0x180] sm:$0xff] }
 0x2b3   :  { %1711 = vmatprep.subr.mxu1 %v2254_v1  ;;  %1667 = vmatmul.mubr.f32.gmra.mxu1 %v503_v38 }
 0x2b4   :  { %1712 = vmatpush3.msra.mxu1 %v2254_v1 }
 0x2b5   :  { %1713 = vmatprep.subr.mxu1 %v2259_v3 }
 0x2b6   :  { %1714 = vmatpush3.msra.mxu1 %v2259_v3 }
 0x2b7   :  { %1715 = vmatprep.subr.mxu1 %v2263_v5 }
 0x2b8   :  { %1716 = vmatpush3.msra.mxu1 %v2263_v5 }
 0x2b9   :  { %1717 = vmatprep.subr.mxu1 %v2268_v6 }
 0x2ba   :  { %1718 = vmatpush3.msra.mxu1 %v2268_v6 }
 0x2bb   :  { %1719 = vmatprep.subr.mxu1 %v2272_v7 }
 0x2bc   :  { %1720 = vmatpush3.msra.mxu1 %v2272_v7 }
 0x2bd   :  { %1721 = vmatprep.subr.mxu1 %v2276_v8 }
 0x2be   :  { %1722 = vmatpush3.msra.mxu1 %v2276_v8 }
 0x2bf   :  { %1723 = vmatprep.subr.mxu1 %v2280_v9 }
 0x2c0   :  { %1724 = vmatpush3.msra.mxu1 %v2280_v9 }
 0x2c1   :  { %1725 = vmatprep.subr.mxu1 %v2284_v10 }
 0x2c2   :  { %1726 = vmatpush3.msra.mxu1 %v2284_v10 }
 0x2c3   :  { %1727 = vmatprep.subr.mxu1 %v2288_v11 }
 0x2c4   :  { %1728 = vmatpush3.msra.mxu1 %v2288_v11 }
 0x2c5   :  { %1729 = vmatprep.subr.mxu1 %v2292_v12 }
 0x2c6   :  { %1730 = vmatpush3.msra.mxu1 %v2292_v12 }
 0x2c7   :  { %1731 = vmatprep.subr.mxu1 %v2296_v13 }
 0x2c8   :  { %1732 = vmatpush3.msra.mxu1 %v2296_v13 }
 0x2c9   :  { %1733 = vmatprep.subr.mxu1 %v2300_v14  ;;  %v1703_v41 = vpop.f32.mrf.mxu0 }
 0x2ca   :  { %1734 = vmatpush3.msra.mxu1 %v2300_v14  ;;  %v680_v44 = vadd.f32 %v1703_v41, %v2100_v22 }
 0x2cb   :  { %1735 = vmatprep.subr.mxu1 %v2304_v15  ;;  %v674_v42 = vpop.f32.mrf.mxu0 }
 0x2cc   :  { %v675_v43 = vadd.f32 %v674_v42, %v2097_v21  ;;  %1736 = vmatpush3.msra.mxu1 %v2304_v15 }
 0x2cd   :  { %1737 = vmatprep.subr.mxu1 %v2308_v16  ;;  %v1706_v45 = vpop.f32.mrf.mxu0 }
 0x2ce   :  { %1738 = vmatpush3.msra.mxu1 %v2308_v16  ;;  %1739 = vmatprep.mubr.f32.mxu1 %v675_v43  ;;  %v690_v47 = vadd.f32 %v1706_v45, %v2103_v24 }
 0x2cf   :  { %1783 = vmatprep.subr.mxu1 %v2349_v20  ;;  %1740 = vmatmul.mubr.f32.vlgmr.msra.gmra.mxu1 %v680_v44  ;;  %v684_v48 = vpop.f32.mrf.mxu0 }
 0x2d0   :  { %1784 = vmatpush3.msra.mxu1 %v2349_v20  ;;  %v685_v50 = vadd.f32 %v684_v48, %v2106_v26 }
 0x2d1   :  { %1785 = vmatprep.subr.mxu1 %v2393_v46 }
 0x2d2   :  { %1786 = vmatpush3.msra.mxu1 %v2393_v46  ;;  %1742 = vmatprep.mubr.f32.mxu1 %v685_v50 }
 0x2d3   :  { %1787 = vmatprep.subr.mxu1 %v2398_v49  ;;  %1743 = vmatmul.mubr.f32.gmra.mxu1 %v690_v47 }
 0x2d4   :  { %1788 = vmatpush3.msra.mxu1 %v2398_v49  ;;  %1815 = vmatprep.mubr.f32.mxu1 %v2017_v4  ;;  %v2424_v4 = vld [vmem:[#allocation2 + $0x1b8] sm:$0xff] }
 0x2d5   :  { %1789 = vmatprep.subr.mxu1 %v2403_v51 }
 0x2d6   :  { %1790 = vmatpush3.msra.mxu1 %v2403_v51 }
 0x2d7   :  { %1791 = vmatprep.subr.mxu1 %v2407_v52 }
 0x2d8   :  { %1792 = vmatpush3.msra.mxu1 %v2407_v52 }
 0x2d9   :  { %1793 = vmatprep.subr.mxu1 %v2412_v53 }
 0x2da   :  { %1794 = vmatpush3.msra.mxu1 %v2412_v53 }
 0x2db   :  { %1795 = vmatprep.subr.mxu1 %v2416_v54 }
 0x2dc   :  { %1796 = vmatpush3.msra.mxu1 %v2416_v54 }
 0x2dd   :  { %1797 = vmatprep.subr.mxu1 %v2420_v55 }
 0x2de   :  { %1798 = vmatpush3.msra.mxu1 %v2420_v55 }
 0x2df   :  { %1799 = vmatprep.subr.mxu1 %v2424_v4 }
 0x2e0   :  { %1800 = vmatpush3.msra.mxu1 %v2424_v4 }
 0x2e1   :  { %1801 = vmatprep.subr.mxu1 %v2428_v56 }
 0x2e2   :  { %1802 = vmatpush3.msra.mxu1 %v2428_v56 }
 0x2e3   :  { %1803 = vmatprep.subr.mxu1 %v2432_v57 }
 0x2e4   :  { %1804 = vmatpush3.msra.mxu1 %v2432_v57 }
 0x2e5   :  { %1805 = vmatprep.subr.mxu1 %v2436_v58 }
 0x2e6   :  { %1806 = vmatpush3.msra.mxu1 %v2436_v58 }
 0x2e7   :  { %1807 = vmatprep.subr.mxu1 %v2440_v59 }
 0x2e8   :  { %1808 = vmatpush3.msra.mxu1 %v2440_v59 }
 0x2e9   :  { %1809 = vmatprep.subr.mxu1 %v2444_v60 }
 0x2ea   :  { %1810 = vmatpush3.msra.mxu1 %v2444_v60 }
 0x2eb   :  { %1811 = vmatprep.subr.mxu1 %v2448_v61 }
 0x2ec   :  { %1812 = vmatpush3.msra.mxu1 %v2448_v61 }
 0x2ed   :  { %1813 = vmatprep.subr.mxu1 %v2452_v62 }
 0x2ee   :  { %1814 = vmatpush3.msra.mxu1 %v2452_v62 }
 0x2ef   :  { %1816 = vmatmul.mubr.f32.vlgmr.msra.gmra.mxu1 %v2063_v17  ;;  %1859 = vmatprep.subr.mxu1 %v2349_v20 }
 0x2f0   :  { %1818 = vmatprep.mubr.f32.mxu1 %v2065_v18  ;;  %1860 = vmatpush3.msra.mxu1 %v2349_v20 }
 0x2f1   :  { %1861 = vmatprep.subr.mxu1 %v2393_v46 }
 0x2f2   :  { %1862 = vmatpush3.msra.mxu1 %v2393_v46 }
 0x2f3   :  { %1819 = vmatmul.mubr.f32.gmra.mxu1 %v2069_v19  ;;  %1863 = vmatprep.subr.mxu1 %v2398_v49 }
 0x2f4   :  { %1864 = vmatpush3.msra.mxu1 %v2398_v49 }
 0x2f5   :  { %1865 = vmatprep.subr.mxu1 %v2403_v51 }
 0x2f6   :  { %1866 = vmatpush3.msra.mxu1 %v2403_v51 }
 0x2f7   :  { %1867 = vmatprep.subr.mxu1 %v2407_v52 }
 0x2f8   :  { %1868 = vmatpush3.msra.mxu1 %v2407_v52 }
 0x2f9   :  { %1869 = vmatprep.subr.mxu1 %v2412_v53 }
 0x2fa   :  { %1870 = vmatpush3.msra.mxu1 %v2412_v53 }
 0x2fb   :  { %1871 = vmatprep.subr.mxu1 %v2416_v54 }
 0x2fc   :  { %1872 = vmatpush3.msra.mxu1 %v2416_v54 }
 0x2fd   :  { %1873 = vmatprep.subr.mxu1 %v2420_v55 }
 0x2fe   :  { %1874 = vmatpush3.msra.mxu1 %v2420_v55 }
 0x2ff   :  { %1875 = vmatprep.subr.mxu1 %v2424_v4 }
 0x300   :  { %1876 = vmatpush3.msra.mxu1 %v2424_v4 }
 0x301   :  { %1877 = vmatprep.subr.mxu1 %v2428_v56 }
 0x302   :  { %1878 = vmatpush3.msra.mxu1 %v2428_v56 }
 0x303   :  { %1879 = vmatprep.subr.mxu1 %v2432_v57 }
 0x304   :  { %1880 = vmatpush3.msra.mxu1 %v2432_v57 }
 0x305   :  { %1881 = vmatprep.subr.mxu1 %v2436_v58 }
 0x306   :  { %1882 = vmatpush3.msra.mxu1 %v2436_v58 }
 0x307   :  { %1883 = vmatprep.subr.mxu1 %v2440_v59 }
 0x308   :  { %1884 = vmatpush3.msra.mxu1 %v2440_v59 }
 0x309   :  { %1885 = vmatprep.subr.mxu1 %v2444_v60 }
 0x30a   :  { %1886 = vmatpush3.msra.mxu1 %v2444_v60 }
 0x30b   :  { %1887 = vmatprep.subr.mxu1 %v2448_v61 }
 0x30c   :  { %1888 = vmatpush3.msra.mxu1 %v2448_v61 }
 0x30d   :  { %1889 = vmatprep.subr.mxu1 %v2452_v62 }
 0x30e   :  { %1890 = vmatpush3.msra.mxu1 %v2452_v62 }
 0x36f   :  { %v1665_v17 = vpop.f32.mrf.mxu1 }
 0x370   :  { %v578_v1 = vadd.f32 %v1665_v17, %v2100_v22 }
 0x371   :  { %v572_v18 = vpop.f32.mrf.mxu1 }
 0x372   :  { %v573_v19 = vadd.f32 %v572_v18, %v2097_v21 }
 0x373   :  { %v1668_v63 = vpop.f32.mrf.mxu1 }
 0x374   :  { %1139 = vxpose.xlu0.b32.cont [5/16] %v573_v19, 128  ;;  %v588_v3 = vadd.f32 %v1668_v63, %v2103_v24 }
 0x375   :  { %v582_v0 = vpop.f32.mrf.mxu1 }
 0x376   :  { %v583_v2 = vadd.f32 %v582_v0, %v2106_v26 }
 0x378   :  { %1140 = vxpose.xlu0.b32.cont [6/16] %v578_v1, 128 }
 0x37c   :  { %1141 = vxpose.xlu0.b32.cont [7/16] %v583_v2, 128 }
 0x380   :  { %1142 = vxpose.xlu0.b32.cont [8/16] %v588_v3, 128 }
 0x38f   :  { %v1741_v5 = vpop.f32.mrf.mxu1 }
 0x390   :  { %v765_v8 = vadd.f32 %v1741_v5, %v2100_v22 }
 0x391   :  { %v759_v6 = vpop.f32.mrf.mxu1 }
 0x392   :  { %v760_v7 = vadd.f32 %v759_v6, %v2097_v21 }
 0x393   :  { %v1744_v9 = vpop.f32.mrf.mxu1 }
 0x394   :  { %1777 = vmatprep.mubr.f32.mxu0 %v760_v7  ;;  %v775_v10 = vadd.f32 %v1744_v9, %v2103_v24 }
 0x395   :  { %1778 = vmatmul.mubr.f32.vlgmr.msra.gmra.mxu0 %v765_v8  ;;  %v769_v11 = vpop.f32.mrf.mxu1 }
 0x396   :  { %1822 = vmatpush3.msra.mxu0 %v2349_v20  ;;  %v770_v12 = vadd.f32 %v769_v11, %v2106_v26 }
 0x397   :  { %1823 = vmatprep.subr.mxu0 %v2393_v46 }
 0x398   :  { %1824 = vmatpush3.msra.mxu0 %v2393_v46  ;;  %1780 = vmatprep.mubr.f32.mxu0 %v770_v12 }
 0x399   :  { %1825 = vmatprep.subr.mxu0 %v2398_v49  ;;  %1781 = vmatmul.mubr.f32.gmra.mxu0 %v775_v10 }
 0x39a   :  { %1826 = vmatpush3.msra.mxu0 %v2398_v49 }
 0x39b   :  { %1827 = vmatprep.subr.mxu0 %v2403_v51 }
 0x39c   :  { %1828 = vmatpush3.msra.mxu0 %v2403_v51 }
 0x39d   :  { %1829 = vmatprep.subr.mxu0 %v2407_v52 }
 0x39e   :  { %1830 = vmatpush3.msra.mxu0 %v2407_v52 }
 0x39f   :  { %1831 = vmatprep.subr.mxu0 %v2412_v53 }
 0x3a0   :  { %1832 = vmatpush3.msra.mxu0 %v2412_v53 }
 0x3a1   :  { %1833 = vmatprep.subr.mxu0 %v2416_v54 }
 0x3a2   :  { %1834 = vmatpush3.msra.mxu0 %v2416_v54 }
 0x3a3   :  { %1835 = vmatprep.subr.mxu0 %v2420_v55 }
 0x3a4   :  { %1836 = vmatpush3.msra.mxu0 %v2420_v55 }
 0x3a5   :  { %1837 = vmatprep.subr.mxu0 %v2424_v4 }
 0x3a6   :  { %1838 = vmatpush3.msra.mxu0 %v2424_v4 }
 0x3a7   :  { %1839 = vmatprep.subr.mxu0 %v2428_v56 }
 0x3a8   :  { %1840 = vmatpush3.msra.mxu0 %v2428_v56 }
 0x3a9   :  { %1841 = vmatprep.subr.mxu0 %v2432_v57 }
 0x3aa   :  { %1842 = vmatpush3.msra.mxu0 %v2432_v57 }
 0x3ab   :  { %1843 = vmatprep.subr.mxu0 %v2436_v58 }
 0x3ac   :  { %1844 = vmatpush3.msra.mxu0 %v2436_v58 }
 0x3ad   :  { %1845 = vmatprep.subr.mxu0 %v2440_v59 }
 0x3ae   :  { %1846 = vmatpush3.msra.mxu0 %v2440_v59 }
 0x3af   :  { %v1817_v13 = vpop.f32.mrf.mxu1  ;;  %1847 = vmatprep.subr.mxu0 %v2444_v60 }
 0x3b0   :  { %1848 = vmatpush3.msra.mxu0 %v2444_v60  ;;  %v952_v16 = vadd.f32 %v1817_v13, %v2100_v22 }
 0x3b1   :  { %v946_v14 = vpop.f32.mrf.mxu1  ;;  %1849 = vmatprep.subr.mxu0 %v2448_v61 }
 0x3b2   :  { %v947_v15 = vadd.f32 %v946_v14, %v2097_v21  ;;  %1850 = vmatpush3.msra.mxu0 %v2448_v61 }
 0x3b3   :  { %v1820_v20 = vpop.f32.mrf.mxu1  ;;  %1851 = vmatprep.subr.mxu0 %v2452_v62 }
 0x3b4   :  { %1852 = vmatpush3.msra.mxu0 %v2452_v62  ;;  %1853 = vmatprep.mubr.f32.mxu0 %v947_v15  ;;  %v962_v23 = vadd.f32 %v1820_v20, %v2103_v24 }
 0x3b5   :  { %v956_v25 = vpop.f32.mrf.mxu1  ;;  %1854 = vmatmul.mubr.f32.vlgmr.msra.gmra.mxu0 %v952_v16 }
 0x3b6   :  { %v957_v27 = vadd.f32 %v956_v25, %v2106_v26 }
 0x3b8   :  { %1856 = vmatprep.mubr.f32.mxu0 %v957_v27 }
 0x3b9   :  { %1857 = vmatmul.mubr.f32.gmra.mxu0 %v962_v23 }
 0x455   :  { %v1779_v28 = vpop.f32.mrf.mxu0 }
 0x456   :  { %v850_v33 = vadd.f32 %v1779_v28, %v2100_v22 }
 0x457   :  { %v844_v29 = vpop.f32.mrf.mxu0 }
 0x458   :  { %v845_v30 = vadd.f32 %v844_v29, %v2097_v21 }
 0x459   :  { %v1782_v31 = vpop.f32.mrf.mxu0 }
 0x45a   :  { %1143 = vxpose.xlu0.b32.cont [9/16] %v845_v30, 128  ;;  %v860_v35 = vadd.f32 %v1782_v31, %v2103_v24 }
 0x45b   :  { %v854_v32 = vpop.f32.mrf.mxu0 }
 0x45c   :  { %v855_v34 = vadd.f32 %v854_v32, %v2106_v26 }
 0x45e   :  { %1144 = vxpose.xlu0.b32.cont [10/16] %v850_v33, 128 }
 0x462   :  { %1145 = vxpose.xlu0.b32.cont [11/16] %v855_v34, 128 }
 0x466   :  { %1146 = vxpose.xlu0.b32.cont [12/16] %v860_v35, 128 }
 0x475   :  { %v1855_v36 = vpop.f32.mrf.mxu0 }
 0x476   :  { %v1037_v39 = vadd.f32 %v1855_v36, %v2100_v22 }
 0x477   :  { %v1031_v37 = vpop.f32.mrf.mxu0 }
 0x478   :  { %v1032_v38 = vadd.f32 %v1031_v37, %v2097_v21 }
 0x479   :  { %v1858_v40 = vpop.f32.mrf.mxu0 }
 0x47a   :  { %1891 = vmatprep.mubr.f32.mxu1 %v1032_v38  ;;  %v1047_v43 = vadd.f32 %v1858_v40, %v2103_v24 }
 0x47b   :  { %v1041_v41 = vpop.f32.mrf.mxu0  ;;  %1892 = vmatmul.mubr.f32.vlgmr.msra.gmra.mxu1 %v1037_v39 }
 0x47c   :  { %v1042_v42 = vadd.f32 %v1041_v41, %v2106_v26 }
 0x47e   :  { %1894 = vmatprep.mubr.f32.mxu1 %v1042_v42 }
 0x47f   :  { %1895 = vmatmul.mubr.f32.gmra.mxu1 %v1047_v43 }
 0x53b   :  { %v1893_v44 = vpop.f32.mrf.mxu1 }
 0x53c   :  { %v1122_v48 = vadd.f32 %v1893_v44, %v2100_v22 }
 0x53d   :  { %v1116_v45 = vpop.f32.mrf.mxu1 }
 0x53e   :  { %v1117_v46 = vadd.f32 %v1116_v45, %v2097_v21 }
 0x53f   :  { %v1896_v47 = vpop.f32.mrf.mxu1 }
 0x540   :  { %1147 = vxpose.xlu0.b32.cont [13/16] %v1117_v46, 128  ;;  %v1132_v51 = vadd.f32 %v1896_v47, %v2103_v24 }
 0x541   :  { %v1126_v49 = vpop.f32.mrf.mxu1 }
 0x542   :  { %v1127_v50 = vadd.f32 %v1126_v49, %v2106_v26 }
 0x544   :  { %1148 = vxpose.xlu0.b32.cont [14/16] %v1122_v48, 128 }
 0x548   :  { %1149 = vxpose.xlu0.b32.cont [15/16] %v1127_v50, 128 }
 0x54c   :  { %1150 = vxpose.xlu0.b32.end [16/16] %v1132_v51, 128 }
 0x58c   :  { %v1151_v52 = vpop.trf.xlu0 }
 0x58d   :  { %1167 = vst [vmem:[#allocation7] sm:$0xff] %v1151_v52 }
 0x590   :  { %v1152_v53 = vpop.trf.xlu0 }
 0x591   :  { %1168 = vst [vmem:[#allocation7 + $0x8] sm:$0xff] %v1152_v53 }
 0x594   :  { %v1153_v54 = vpop.trf.xlu0 }
 0x595   :  { %1169 = vst [vmem:[#allocation7 + $0x10] sm:$0xff] %v1153_v54 }
 0x598   :  { %v1154_v55 = vpop.trf.xlu0 }
 0x599   :  { %1170 = vst [vmem:[#allocation7 + $0x18] sm:$0xff] %v1154_v55 }
 0x59c   :  { %v1155_v21 = vpop.trf.xlu0 }
 0x59d   :  { %1171 = vst [vmem:[#allocation7 + $0x20] sm:$0xff] %v1155_v21 }
 0x5a0   :  { %v1156_v4 = vpop.trf.xlu0 }
 0x5a1   :  { %1172 = vst [vmem:[#allocation7 + $0x28] sm:$0xff] %v1156_v4 }
 0x5a4   :  { %v1157_v22 = vpop.trf.xlu0 }
 0x5a5   :  { %1173 = vst [vmem:[#allocation7 + $0x30] sm:$0xff] %v1157_v22 }
 0x5a8   :  { %v1158_v56 = vpop.trf.xlu0 }
 0x5a9   :  { %1174 = vst [vmem:[#allocation7 + $0x38] sm:$0xff] %v1158_v56 }
 0x5ac   :  { %v1159_v26 = vpop.trf.xlu0 }
 0x5ad   :  { %1175 = vst [vmem:[#allocation7 + $0x40] sm:$0xff] %v1159_v26 }
 0x5b0   :  { %v1160_v24 = vpop.trf.xlu0 }
 0x5b1   :  { %1176 = vst [vmem:[#allocation7 + $0x48] sm:$0xff] %v1160_v24 }
 0x5b4   :  { %v1161_v57 = vpop.trf.xlu0 }
 0x5b5   :  { %1177 = vst [vmem:[#allocation7 + $0x50] sm:$0xff] %v1161_v57 }
 0x5b8   :  { %v1162_v58 = vpop.trf.xlu0 }
 0x5b9   :  { %1178 = vst [vmem:[#allocation7 + $0x58] sm:$0xff] %v1162_v58 }
 0x5bc   :  { %v1163_v59 = vpop.trf.xlu0 }
 0x5bd   :  { %1179 = vst [vmem:[#allocation7 + $0x60] sm:$0xff] %v1163_v59 }
 0x5c0   :  { %v1164_v60 = vpop.trf.xlu0 }
 0x5c1   :  { %1180 = vst [vmem:[#allocation7 + $0x68] sm:$0xff] %v1164_v60 }
 0x5c4   :  { %v1165_v61 = vpop.trf.xlu0 }
 0x5c5   :  { %1181 = vst [vmem:[#allocation7 + $0x70] sm:$0xff] %v1165_v61 }
 0x5c8   :  { %v1166_v62 = vpop.trf.xlu0 }
 0x5c9   :  { %1182 = vst [vmem:[#allocation7 + $0x78] sm:$0xff] %v1166_v62 }
 0x5ca   :  { %1953 = shalt.err (!%p1950_p0)
}
 0x5cb   :  { %1194 = dma.vmem_to_hbm [thread:$0]  %s1189_s1, 2048, %s2556_s2, [#allocation4], %s1969_s12, %s1969_s12, %s1970_s13  }
 0x5cc   :  { %1966 = dma.done.wait [#allocation4], 2048  }
 0x5cd   :  { %1967 = vsyncadd [#allocation4], 4294965248 }
 0x5ce   :  { %1198 = vsyncpa [#allocation3], 1 }
 0x5cf   :  { %1199 = vsyncpa [#allocation6], 1 }
 0x5d0   :  { %1200 = vsyncpa [#allocation4], 1 }

</bundles_post_ra>
